<compile_context>
chip_gen: v6e
topology: v6e:2x2x1
jax: 0.10.0
libtpu: 0.0.40
codegen_flags: <defaults>
</compile_context>

<pallas_src>
import jax
import jax.numpy as jnp
from jax.experimental import pallas as pl
from jax.experimental.pallas import tpu as pltpu

_LANE = 128
# Scoped-VMEM ceiling requested from Mosaic; safely below v7x's 64 MiB
# physical VMEM and far below v5e/v6e's 128 MiB.
_VMEM_LIMIT_BYTES = 56 * 1024 * 1024
# Budget used to size tiles; leaves headroom under _VMEM_LIMIT_BYTES for
# compiler-internal scratch.
_VMEM_TILE_BUDGET_BYTES = 40 * 1024 * 1024


def conv1x1_kernel(x_ref, w_ref, o_ref):
    # x_ref: (C_in, t_hw) spatial tile, w_ref: (C_out, C_in) full weight.
    # Output (C_out, t_hw): lane axis is a multiple of 128 -> unmasked vst
    # (the ragged last grid block is bounded/masked by Pallas's edge DMA).
    o_ref[...] = jnp.dot(
        w_ref[...], x_ref[...], preferred_element_type=jnp.float32
    ).astype(o_ref.dtype)


def _pick_spatial_tile(c_in, c_out, hw, x_itemsize, w_itemsize):
    """Largest lane-aligned spatial tile that fits the VMEM tile budget."""
    hw_lane = pl.cdiv(hw, _LANE) * _LANE
    # Double-buffered x and out tiles + double-buffered (constant-index)
    # weight.  TODO(synk): pipeline_mode=pl.Buffered(1) on the weight spec
    # would single-buffer it and free c_out*c_in*w_itemsize bytes for t_hw.
    w_bytes = 2 * c_out * c_in * w_itemsize
    per_lane = 2 * (c_in + c_out) * x_itemsize
    t_hw = (_VMEM_TILE_BUDGET_BYTES - w_bytes) // per_lane
    t_hw = max(_LANE, (t_hw // _LANE) * _LANE)
    return int(min(t_hw, hw_lane))


def projector_block(x_nchw, weight_oihw):
    """1x1 conv, no bias (equivalent to torch Conv2d k=1, bias=False).

    x_nchw:      (N, C_in, H, W)
    weight_oihw: (C_out, C_in, 1, 1)   (torch Conv2d weight layout)
    returns:     (N, C_out, H, W)
    """
    N, C_in, H, W = x_nchw.shape
    C_out = weight_oihw.shape[0]
    HW = H * W
    dtype = x_nchw.dtype
    x_itemsize = jnp.dtype(dtype).itemsize
    w_itemsize = jnp.dtype(weight_oihw.dtype).itemsize

    # TODO(synk): if upstream activations arrive as bf16 (or downstream
    # accepts bf16 output), pass them through unchanged to halve HBM traffic
    # (keep preferred_element_type=jnp.float32). Kept f32 to match the
    # reference module exactly.

    # (C_out, C_in, 1, 1) -> (C_out, C_in); used directly, no transpose.
    w = weight_oihw.reshape(C_out, C_in)
    # NCHW -> (N, C_in, HW): pure reshape, no data movement.
    x3 = x_nchw.reshape(N, C_in, HW)

    t_hw = _pick_spatial_tile(C_in, C_out, HW, x_itemsize, w_itemsize)
    num_hw_tiles = pl.cdiv(HW, t_hw)
    grid = (N, num_hw_tiles)
    # Megacore note: total grid = N * num_hw_tiles; both axes "parallel" so
    # the 2 TensorCores on v7x share the work whenever N * num_hw_tiles >= 2.

    bytes_accessed = (
        N * C_in * HW * x_itemsize
        + C_out * C_in * w_itemsize
        + N * C_out * HW * x_itemsize
    )

    out3 = pl.pallas_call(
        conv1x1_kernel,
        out_shape=jax.ShapeDtypeStruct((N, C_out, HW), dtype),
        grid_spec=pltpu.PrefetchScalarGridSpec(
            num_scalar_prefetch=0,
            grid=grid,
            in_specs=[
                # (None, ...) squeezes the batch dim; kernel sees (C_in, t_hw).
                pl.BlockSpec((None, C_in, t_hw), lambda n, j: (n, 0, j)),
                # Full weight, constant block index (no re-fetch between steps
                # since the block index never changes).
                pl.BlockSpec((C_out, C_in), lambda n, j: (0, 0)),
            ],
            out_specs=pl.BlockSpec((None, C_out, t_hw), lambda n, j: (n, 0, j)),
        ),
        compiler_params=pltpu.CompilerParams(
            dimension_semantics=("parallel", "parallel"),
            vmem_limit_bytes=_VMEM_LIMIT_BYTES,
        ),
        cost_estimate=pl.CostEstimate(
            flops=2 * N * C_in * C_out * HW,
            transcendentals=0,
            bytes_accessed=bytes_accessed,
        ),
    )(x3, w)

    # (N, C_out, HW) -> NCHW: free reshape, no transpose, no padding to strip.
    return out3.reshape(N, C_out, H, W)


if __name__ == "__main__":
    key = jax.random.PRNGKey(0)
    k_x, k_w = jax.random.split(key)

    # Small shapes consistent with the module: batch=2, in_features=4,
    # out_features=8, spatial 16x16.
    N, C_in, C_out, H, W = 2, 4, 8, 16, 16

    x = jax.random.normal(k_x, (N, C_in, H, W), dtype=jnp.float32)

    # Deterministic init mimicking torch Conv2d default:
    # uniform(-b, b) with b = 1/sqrt(fan_in), fan_in = C_in * 1 * 1.
    bound = 1.0 / jnp.sqrt(jnp.float32(C_in))
    weight = jax.random.uniform(
        k_w, (C_out, C_in, 1, 1), dtype=jnp.float32, minval=-bound, maxval=bound
    )

    out = projector_block(x, weight)
    out = jax.block_until_ready(out)

    # Reference check (plain JAX 1x1 conv as channel matmul).
    ref = jnp.einsum("nchw,oc->nohw", x, weight.reshape(C_out, C_in))
    assert out.shape == (N, C_out, H, W)
    assert jnp.allclose(out, ref, atol=1e-5, rtol=1e-5)

    print("KERNEL_OK")
</pallas_src>

<mosaic_0001>
module attributes {stable_mosaic.version = 11 : i64} {
  func.func @conv1x1_kernel(%arg0: i32, %arg1: i32, %arg2: memref<1x4x256xf32, #tpu.memory_space<vmem>>, %arg3: memref<8x4xf32, #tpu.memory_space<vmem>>, %arg4: memref<1x8x256xf32, #tpu.memory_space<vmem>>) attributes {dimension_semantics = [#tpu.dimension_semantics<parallel>, #tpu.dimension_semantics<parallel>], iteration_bounds = array<i64: 2, 1>, scalar_prefetch = 0 : i64, scratch_operands = 0 : i64, tpu.core_type = #tpu.core_type<tc>, window_params = [{transform_indices = @transform_0, window_bounds = array<i64: 1, 4, 256>}, {pipeline_mode = #tpu.pipeline_mode<synchronous>, transform_indices = @transform_1, window_bounds = array<i64: 8, 4>}, {transform_indices = @transform_2, window_bounds = array<i64: 1, 8, 256>}]} {
    %c0 = arith.constant 0 : index
    %c0_0 = arith.constant 0 : index
    %0 = vector.load %arg3[%c0, %c0_0] : memref<8x4xf32, #tpu.memory_space<vmem>>, vector<8x4xf32>
    %c0_1 = arith.constant 0 : index
    %c0_2 = arith.constant 0 : index
    %c0_3 = arith.constant 0 : index
    %1 = vector.load %arg2[%c0_1, %c0_2, %c0_3] : memref<1x4x256xf32, #tpu.memory_space<vmem>>, vector<1x4x256xf32>
    %2 = vector.shape_cast %1 : vector<1x4x256xf32> to vector<4x256xf32>
    %cst = arith.constant dense<0.000000e+00> : vector<8x256xf32>
    %3 = tpu.matmul %0, %2, %cst {dimension_numbers = #tpu.dot_dimension_numbers<[1], [0], [0], [1], [0, 0, 1, 1], [], []>} : vector<8x4xf32>, vector<4x256xf32>, vector<8x256xf32> -> vector<8x256xf32>
    %c0_4 = arith.constant 0 : index
    %c0_5 = arith.constant 0 : index
    %c0_6 = arith.constant 0 : index
    %4 = vector.load %arg4[%c0_4, %c0_5, %c0_6] : memref<1x8x256xf32, #tpu.memory_space<vmem>>, vector<1x8x256xf32>
    %5 = vector.shape_cast %4 : vector<1x8x256xf32> to vector<8x256xf32>
    %6 = vector.shape_cast %3 : vector<8x256xf32> to vector<1x8x256xf32>
    tpu.vector_store %arg4[%c0_4, %c0_5, %c0_6], %6 {strides = array<i32>} : memref<1x8x256xf32, #tpu.memory_space<vmem>>, vector<1x8x256xf32>,
    return
  }
  func.func @transform_0(%arg0: i32, %arg1: i32) -> (i32, i32, i32) {
    %c0_i32 = arith.constant 0 : i32
    %c0_i32_0 = arith.constant 0 : i32
    return %arg0, %c0_i32, %arg1 : i32, i32, i32
  }
  func.func @transform_1(%arg0: i32, %arg1: i32) -> (i32, i32) {
    %c0_i32 = arith.constant 0 : i32
    %c0_i32_0 = arith.constant 0 : i32
    %c0_i32_1 = arith.constant 0 : i32
    return %c0_i32, %c0_i32_0 : i32, i32
  }
  func.func @transform_2(%arg0: i32, %arg1: i32) -> (i32, i32, i32) {
    %c0_i32 = arith.constant 0 : i32
    %c0_i32_0 = arith.constant 0 : i32
    return %arg0, %c0_i32, %arg1 : i32, i32, i32
  }
}

</mosaic_0001>

<bundles_post_ra>
// kernel: tpu_custom_call.1
= control target key start
LH: loop header
LB: loop body
LE: loop exit
PB: predicated region body
PF: predicated region fallthrough
CT: control target
= control target key end

     0   :  { %7 = vsyncpa [#allocation3], 0  ;;  %s723_s0 = inlined_call_operand.hbm [shape: f32[2,4,256], index: 0, kind: input, shape index: {}]   ;;  %s724_s1 = inlined_call_operand.vmem [shape: f32[8,4], index: 1, kind: input, shape index: {}]   ;;  %s725_s2 = inlined_call_operand.hbm [shape: f32[2,8,256], index: 2, kind: output, shape index: {}]  }
   0x1   :  { %9 = vsyncpa [#allocation3 + $0x1], 0 }
   0x2   :  { %10 = vsyncpa [#allocation4], 0 }
   0x3   :  { %12 = vsyncpa [#allocation4 + $0x1], 0  ;;  %s579_s9 = smov 0   ;;  %s581_s10 = smov 0  }
   0x4   :  { %s583_s11 = smov 0   ;;  %s585_s12 = smov 0  }
   0x5   :  { %s587_s13 = smov 0   ;;  %s589_s14 = smov 0  }
   0x6 LB: > { %s367_s15 = sadd.s32 4294967295, %s559_s14   ;;  %s368_s16 = sadd.s32 4294967294, %s559_s14   ;;  %s559_s14 = sphi %s589_s14, %s18_s14   ;;  %s555_s13 = sphi %s587_s13, %s737_s13   ;;  %s551_s12 = sphi %s585_s12, %s736_s12   ;;  %s547_s11 = sphi %s583_s11, %s735_s11   ;;  %s543_s10 = sphi %s581_s10, %s734_s10   ;;  %s539_s9 = sphi %s579_s9, %s733_s9  }
   0x7   : > { %s30_s17 = sadd.s32 1, %s555_s13  ;;  %s39_s18 = sadd.s32 1, %s547_s11 }
   0x8   : > { %p32_p0 = scmp.ge.s32.totalorder %s30_s17, 2  ;;  %p46_p1 = scmp.ne.s32.totalorder %s547_s11, %s543_s10 }
   0x9   : > { %p47_p2 = scmp.eq.s32.totalorder %s559_s14, 0  ;;  %p52_p3 = scmp.ne.s32.totalorder %s543_s10, %s539_s9 }
   0xa   : > { %s739_s17 = smov (%p32_p0, %s30_s17), 0  ;;  %p53_p5 = scmp.eq.s32.totalorder %s367_s15, 0 }
   0xb   : > { %p620_p4 = por %p47_p2, %p46_p1  ;;  %s34_s20 = ssub.s32 %s555_s13, %s739_s17 }
   0xc   : > { %p99_p6 = scmp.eq.s32.totalorder %s367_s15, 1  ;;  %p37_p7 = scmp.eq.s32.totalorder %s34_s20, 0 }
   0xd   : > { %p626_p8 = por %p53_p5, %p52_p3  ;;  %p105_p10 = scmp.eq.s32.totalorder %s368_s16, 1 }
   0xe   : > { %p630_p9 = por %p99_p6, %p46_p1  ;;  %p399_p13 = scmp.lt.s32.totalorder %s559_s14, 2 }
   0xf   : > { %s635_s23 = scalar_select %p37_p7, %s547_s11, %s39_s18  }
  0x10   : > { %p637_p11 = por %p105_p10, %p52_p3  ;;  %s128_s25 = sand.u32 1, %s547_s11  }
  0x11   : > { %s371_s26 = sshll.u32 %s128_s25, 3  ;;  %s385_s27 = sshll.u32 %s555_s13, 7 }
  0x12   : > { %s729_s24 = scalar_select %p637_p11, 1, 0 }
  0x13   : > { %s140_s30 = scalar_lea.hbm %s723_s0, %s385_s27  ;;  %s132_s3 = scalar_lea.vmem [#allocation2], %s371_s26 }
  0x14   : > { %s142_s4 = sshll.u32 %s132_s3, 4  ;;  %p650_p0 = pnand %p399_p13, %p620_p4  ;;  %s143_s4 = int_to_ptr.vmem [resolvable:$true] %s142_s4 }
  0x15   : > { %p374_p1 = scmp.ge.s32.totalorder %s559_s14, 1  ;;  %p147_p2 = scmp.lt.s32.totalorder %s559_s14, 3 }
  0x16   : > { %s129_s6 = scalar_lea.sflag [#allocation3], %s128_s25  ;;  %p453_p3 = pneg %p650_p0 }
  0x17   : > { %s464_s7 = scalar_lea.vmem %s143_s4, 128  ;;  %s561_s8 = smov [#allocation2]  }
  0x18   : > { %p465_p5 = scmp.ne.s32.totalorder %s143_s4, %s464_s7  ;;  %s469_s15 = sshll.u32 %s561_s8, 4  ;;  %s470_s15 = int_to_ptr.vmem [resolvable:$false] %s469_s15 }
  0x19   : > { %s471_s16 = scalar_lea.vmem %s470_s15, 256  ;;  %p472_p10 = scmp.lt.s32.totalorder %s143_s4, %s470_s15 }
  0x1a   : > { %p467_p6 = pnand %p465_p5, %p453_p3  ;;  %p473_p12 = scmp.lt.s32.totalorder %s471_s16, %s464_s7 }
  0x1c   : > { %p468_p7 = pneg %p467_p6  ;;  %p474_p4 = por %p473_p12, %p472_p10 }
  0x1e   : > { %p475_p13 = pnand %p474_p4, %p468_p7 }
  0x20   : > { %478 = shalt.err (!%p475_p13)
}
  0x21   : > { %394 = dma.hbm_to_vmem [thread:$0]  (!%p650_p0), %s140_s30, 128, %s143_s4, %s129_s6  }
  0x22   : > { %p148_p11 = pnand %p374_p1, %p147_p2 }
  0x23   : > { %s665_s18 = sand.u32 (!%p148_p11), 1, %s543_s10  }
  0x24   : > { %151 = sbr.rel (%p148_p11) target bundleno = 255 (0xff), region = 28  ;;  %s375_s19 = sshll.u32 (!%p148_p11), %s665_s18, 3 }
  0x25   : > { %s154_s20 = scalar_lea.sflag (!%p148_p11), [#allocation3], %s665_s18  ;;  %s157_s25 = scalar_lea.vmem (!%p148_p11), [#allocation2], %s375_s19 }
  0x29   : > { %530 = dma.done.wait (%p626_p8), %s154_s20, 128  }
  0x2a   : > { %532 = vsyncadd (%p626_p8), %s154_s20, 4294967168  ;;  %v562_v0 = vmov 0.0   ;;  %v181_v1 = vld [vmem:[%s157_s25] sm:$0xff]  ;;  %vm188_vm0 = vcmask 1043456   ;;  %vm184_vm1 = vcmask 31744   ;;  %s376_s28 = sshll.u32 %s665_s18, 4 }
  0x2b   : > { %257 = vmatprep.mubr.f32.mxu0 %v562_v0  ;;  %v183_v2 = vcombine.high %v181_v1, %v181_v1  ;;  %v180_v3 = vld [vmem:[%s724_s1] sm:$0xff]  ;;  %s177_s21 = scalar_lea.vmem [#allocation5], %s376_s28  ;;  %s386_s30 = sshll.u32 %s551_s12, 8 }
  0x2c   : > { %s283_s29 = sshll.u32 %s177_s21, 4  ;;  %s281_s5 = scalar_lea.hbm %s725_s2, %s386_s30  ;;  %s678_s29 = int_to_ptr.vmem [resolvable:$true] %s283_s29 }
  0x2d   : > { %377 = vmatprep.subr.msk.mxu0 %vm188_vm0, %v183_v2  ;;  %s267_s6 = scalar_lea.sflag [#allocation4], %s665_s18  ;;  %s479_s7 = scalar_lea.vmem %s678_s29, 256 }
  0x2e   : > { %378 = vmatpush1.msk.msra.mxu0 %vm188_vm0, %v181_v1  ;;  %p480_p8 = scmp.ne.s32.totalorder %s678_s29, %s479_s7  ;;  %s563_s12 = smov [#allocation5]  }
  0x2f   : > { %379 = vmatmul.mubr.msk.f32.vlgmr.msra.gmra.mxu0 %vm184_vm1, %v180_v3  ;;  %s483_s8 = sshll.u32 %s563_s12, 4  ;;  %s484_s8 = int_to_ptr.vmem [resolvable:$false] %s483_s8 }
  0x30   : > { %p481_p11 = pnand %p480_p8, %p630_p9  ;;  %s485_s15 = scalar_lea.vmem %s484_s8, 512 }
  0x31   : > { %p486_p0 = scmp.lt.s32.totalorder %s678_s29, %s484_s8  ;;  %p487_p1 = scmp.lt.s32.totalorder %s485_s15, %s479_s7 }
  0x32   : > { %p482_p12 = pneg %p481_p11 }
  0x33   : > { %p488_p2 = por %p487_p1, %p486_p0 }
  0x35   : > { %p489_p3 = pnand %p488_p2, %p482_p12 }
  0xef   : > { %v259_v4 = vpop.f32.mrf.mxu0 }
  0xf0   : > { %264 = vst [vmem:[%s177_s21] sm:$0xff] %v259_v4 }
  0xf1   : > { %v261_v5 = vpop.f32.mrf.mxu0 }
  0xf2   : > { %265 = vst [vmem:[%s177_s21 + $0x8] sm:$0xff] %v261_v5 }
  0xf3   : > { %492 = shalt.err (!%p489_p3)
}
  0xf4   : > { %s493_s16 = scalar_lea.hbm %s281_s5, 256  ;;  %s497_s20 = scalar_lea.hbm %s725_s2, 512 }
  0xf5   : > { %p494_p5 = scmp.ne.s32.totalorder %s281_s5, %s493_s16  ;;  %p498_p10 = scmp.lt.s32.totalorder %s281_s5, %s725_s2 }
  0xf6   : > { %p499_p4 = scmp.lt.s32.totalorder %s497_s20, %s493_s16 }
  0xf7   : > { %p495_p6 = pnand %p494_p5, %p630_p9 }
  0xf8   : > { %p500_p13 = por %p499_p4, %p498_p10 }
  0xf9   : > { %p496_p7 = pneg %p495_p6 }
  0xfb   : > { %p501_p8 = pnand %p500_p13, %p496_p7 }
  0xfd   : > { %504 = shalt.err (!%p501_p8)
}
  0xfe   : > { %389 = dma.vmem_to_hbm [thread:$0]  (%p630_p9), %s678_s29, 256, %s281_s5, %s267_s6  }
  0xff PF: > { %s295_s27 = sand.u32 1, %s539_s9   ;;  %p731_p11 = scmp.ne.s32.totalorder %s729_s24, 0 }
 0x100   : > { %p732_p12 = scmp.ge.s32.totalorder %s559_s14, 2  ;;  %s296_s28 = scalar_lea.sflag [#allocation4], %s295_s27 }
 0x102   : > { %p396_p0 = pnand %p732_p12, %p731_p11 }
 0x104   : > { %p397_p1 = pneg %p396_p0 }
 0x106   : > { %534 = dma.done.wait (%p397_p1), %s296_s28, 256  }
 0x107   : > { %536 = vsyncadd (%p397_p1), %s296_s28, 4294967040  ;;  %s18_s14 = sadd.s32 1, %s559_s14   ;;  %s733_s9 = smov %s543_s10 }
 0x108   : > { %p15_p2 = scmp.ge.s32.totalorder %s18_s14, 4   ;;  %s734_s10 = smov %s547_s11 }
 0x109   : > { %s735_s11 = smov %s635_s23  ;;  %s736_s12 = smov %s555_s13 }
 0x10a   : > { %s737_s13 = smov %s739_s17  ;;  %17 = sbr.rel (!%p15_p2) target bundleno = 6 (0x6), region = 73 }
 0x10f   :  { %301 = vsyncpa [#allocation3], 1 }
 0x110   :  { %303 = vsyncpa [#allocation3 + $0x1], 1 }
 0x111   :  { %304 = vsyncpa [#allocation4], 1 }
 0x112   :  { %306 = vsyncpa [#allocation4 + $0x1], 1 }

</bundles_post_ra>
